<compile_context>
chip_gen: v5e
topology: v5e:2x2
jax: 0.10.0
libtpu: 0.0.40
codegen_flags: <defaults>
</compile_context>

<pallas_src>
import functools

import jax
import jax.numpy as jnp
from jax.experimental import pallas as pl
from jax.experimental.pallas import tpu as pltpu


def _make_linear_kernel(compute_dtype):
    def _linear_kernel(x_ref, w_ref, b_ref, o_ref):
        """y = x @ W + b  (W already in [K, N] layout), f32 accumulation.

        x_ref: (TILE_B, n_inputs)    activations
        w_ref: (n_inputs, n_hidden)  weight, canonical (K, N) -- lane-dense on N
        b_ref: (1, n_hidden)         bias (kept in f32)
        o_ref: (TILE_B, n_hidden)    output (lane-dense when n_hidden % 128 == 0)
        """
        x = x_ref[...].astype(compute_dtype)
        w = w_ref[...].astype(compute_dtype)
        acc = jnp.dot(x, w, preferred_element_type=jnp.float32)
        o_ref[...] = (acc + b_ref[...]).astype(o_ref.dtype)

    return _linear_kernel


@functools.partial(jax.jit, static_argnames=("tile_b", "use_bf16"))
def sender_forward(x, weight, bias, *, tile_b=512, use_bf16=False):
    """Sender.forward: nn.Linear(n_inputs, n_hidden) applied to x.

    x     : [..., n_inputs] float32
    weight: [n_hidden, n_inputs] float32 (PyTorch Linear layout)
    bias  : [n_hidden] float32
    returns [..., n_hidden] float32

    tile_b  : batch-rows per grid step (production knob; sized well under the
              v7x 32 MiB default scoped-VMEM limit even double-buffered).
    use_bf16: cast x/W to bf16 before the MXU dot (f32 accumulation kept) --
              only worthwhile once the op is compute-bound.
    """
    n_hidden, n_inputs = weight.shape
    lead_shape = x.shape[:-1]
    x2d = x.reshape(-1, n_inputs)          # cheap reshape, not a transpose
    B = x2d.shape[0]

    # One-time layout fixes (constant params -> folded by XLA, zero per-step cost).
    w_t = weight.T                          # [n_inputs, n_hidden] = (K, N)
    bias2d = bias.reshape(1, n_hidden)

    # Batch tile: multiple of 8 sublanes, clamped to the (padded) batch.
    tb = min(tile_b, max(B, 8))
    tb = ((tb + 7) // 8) * 8
    b_padded = ((B + tb - 1) // tb) * tb
    if b_padded != B:
        x2d = jnp.pad(x2d, ((0, b_padded - B), (0, 0)))
    grid = (b_padded // tb,)

    compute_dtype = jnp.bfloat16 if use_bf16 else x.dtype
    kernel = _make_linear_kernel(compute_dtype)

    out = pl.pallas_call(
        kernel,
        out_shape=jax.ShapeDtypeStruct((b_padded, n_hidden), x.dtype),
        grid_spec=pltpu.PrefetchScalarGridSpec(
            num_scalar_prefetch=0,
            grid=grid,
            in_specs=[
                # Activations: one batch tile per grid step.
                pl.BlockSpec((tb, n_inputs), lambda i: (i, 0)),
                # Weight + bias: index_map is constant -> DMA'd once, stays
                # resident in VMEM across all batch tiles.
                pl.BlockSpec((n_inputs, n_hidden), lambda i: (0, 0)),
                pl.BlockSpec((1, n_hidden), lambda i: (0, 0)),
            ],
            out_specs=pl.BlockSpec((tb, n_hidden), lambda i: (i, 0)),
        ),
        compiler_params=pltpu.CompilerParams(
            # Batch tiles are independent -> shard across both v7x TensorCores.
            dimension_semantics=("parallel",),
        ),
    )(x2d, w_t, bias2d)

    if b_padded != B:
        out = out[:B]
    return out.reshape(*lead_shape, n_hidden)


def _reference(x, weight, bias):
    """Pure-JAX reference matching torch.nn.Linear semantics."""
    return jnp.matmul(x, weight.T) + bias


if __name__ == "__main__":
    key = jax.random.PRNGKey(0)
    kx, kw, kb, kx2 = jax.random.split(key, 4)

    # Small shapes consistent with the module; n_hidden = 128 keeps the output
    # store lane-dense (the biggest measured lever in the perf review).
    B, n_inputs, n_hidden = 8, 64, 128
    x = jax.random.normal(kx, (B, n_inputs), dtype=jnp.float32)
    weight = jax.random.normal(kw, (n_hidden, n_inputs), dtype=jnp.float32) * 0.1
    bias = jax.random.normal(kb, (n_hidden,), dtype=jnp.float32) * 0.1

    out = jax.block_until_ready(sender_forward(x, weight, bias))
    ref = jax.block_until_ready(_reference(x, weight, bias))
    assert out.shape == (B, n_hidden), out.shape
    assert jnp.allclose(out, ref, atol=1e-4, rtol=1e-4), float(
        jnp.max(jnp.abs(out - ref))
    )

    # Exercise the multi-tile, weight-resident "parallel" grid path (including
    # row padding for a batch that is not a multiple of the tile).
    B2 = 200
    x2 = jax.random.normal(kx2, (B2, n_inputs), dtype=jnp.float32)
    out2 = jax.block_until_ready(sender_forward(x2, weight, bias, tile_b=64))
    ref2 = jax.block_until_ready(_reference(x2, weight, bias))
    assert out2.shape == (B2, n_hidden), out2.shape
    assert jnp.allclose(out2, ref2, atol=1e-4, rtol=1e-4), float(
        jnp.max(jnp.abs(out2 - ref2))
    )

    print("KERNEL_OK")
</pallas_src>

<mosaic_0001>
module attributes {stable_mosaic.version = 11 : i64} {
  func.func @_linear_kernel(%arg0: i32, %arg1: memref<8x64xf32, #tpu.memory_space<vmem>>, %arg2: memref<64x128xf32, #tpu.memory_space<vmem>>, %arg3: memref<1x128xf32, #tpu.memory_space<vmem>>, %arg4: memref<8x128xf32, #tpu.memory_space<vmem>>) attributes {dimension_semantics = [#tpu.dimension_semantics<parallel>], iteration_bounds = array<i64: 1>, scalar_prefetch = 0 : i64, scratch_operands = 0 : i64, tpu.core_type = #tpu.core_type<tc>, window_params = [{transform_indices = @transform_0, window_bounds = array<i64: 8, 64>}, {pipeline_mode = #tpu.pipeline_mode<synchronous>, transform_indices = @transform_1, window_bounds = array<i64: 64, 128>}, {pipeline_mode = #tpu.pipeline_mode<synchronous>, transform_indices = @transform_2, window_bounds = array<i64: 1, 128>}, {transform_indices = @transform_3, window_bounds = array<i64: 8, 128>}]} {
    %c0 = arith.constant 0 : index
    %c0_0 = arith.constant 0 : index
    %0 = vector.load %arg1[%c0, %c0_0] : memref<8x64xf32, #tpu.memory_space<vmem>>, vector<8x64xf32>
    %c0_1 = arith.constant 0 : index
    %c0_2 = arith.constant 0 : index
    %1 = vector.load %arg2[%c0_1, %c0_2] : memref<64x128xf32, #tpu.memory_space<vmem>>, vector<64x128xf32>
    %cst = arith.constant dense<0.000000e+00> : vector<8x128xf32>
    %2 = tpu.matmul %0, %1, %cst {dimension_numbers = #tpu.dot_dimension_numbers<[1], [0], [0], [1], [0, 0, 1, 1], [], []>} : vector<8x64xf32>, vector<64x128xf32>, vector<8x128xf32> -> vector<8x128xf32>
    %c0_3 = arith.constant 0 : index
    %c0_4 = arith.constant 0 : index
    %3 = vector.load %arg3[%c0_3, %c0_4] : memref<1x128xf32, #tpu.memory_space<vmem>>, vector<1x128xf32>
    %4 = vector.broadcast %3 : vector<1x128xf32> to vector<8x128xf32>
    %5 = arith.addf %2, %4 : vector<8x128xf32>
    %c0_5 = arith.constant 0 : index
    %c0_6 = arith.constant 0 : index
    %6 = vector.load %arg4[%c0_5, %c0_6] : memref<8x128xf32, #tpu.memory_space<vmem>>, vector<8x128xf32>
    tpu.vector_store %arg4[%c0_5, %c0_6], %5 {strides = array<i32>} : memref<8x128xf32, #tpu.memory_space<vmem>>, vector<8x128xf32>,
    return
  }
  func.func @transform_0(%arg0: i32) -> (i32, i32) {
    %c0_i32 = arith.constant 0 : i32
    %c0_i32_0 = arith.constant 0 : i32
    return %arg0, %c0_i32 : i32, i32
  }
  func.func @transform_1(%arg0: i32) -> (i32, i32) {
    %c0_i32 = arith.constant 0 : i32
    %c0_i32_0 = arith.constant 0 : i32
    %c0_i32_1 = arith.constant 0 : i32
    return %c0_i32, %c0_i32_0 : i32, i32
  }
  func.func @transform_2(%arg0: i32) -> (i32, i32) {
    %c0_i32 = arith.constant 0 : i32
    %c0_i32_0 = arith.constant 0 : i32
    %c0_i32_1 = arith.constant 0 : i32
    return %c0_i32, %c0_i32_0 : i32, i32
  }
  func.func @transform_3(%arg0: i32) -> (i32, i32) {
    %c0_i32 = arith.constant 0 : i32
    %c0_i32_0 = arith.constant 0 : i32
    return %arg0, %c0_i32 : i32, i32
  }
}

</mosaic_0001>

<bundles_post_ra>
// kernel: sender_forward.1
= control target key start
LH: loop header
LB: loop body
LE: loop exit
PB: predicated region body
PF: predicated region fallthrough
CT: control target
= control target key end

     0   :  { %8 = vsyncpa [#allocation3], 0  ;;  %s223_s0 = inlined_call_operand.hbm [shape: f32[8,64], index: 0, kind: input, shape index: {}]   ;;  %s224_s1 = inlined_call_operand.hbm [shape: f32[64,128], index: 1, kind: input, shape index: {}]   ;;  %s225_s2 = inlined_call_operand.vmem [shape: f32[1,128], index: 2, kind: input, shape index: {}]   ;;  %s226_s3 = inlined_call_operand.hbm [shape: f32[8,128], index: 3, kind: output, shape index: {}]  }
   0x1   :  { %9 = vsyncpa [#allocation6], 0 }
   0x2   :  { %10 = vsyncpa [#allocation4], 0  ;;  %s16_s14 = sshll.u32 %s223_s0, 4  ;;  %s186_s15 = smov [#allocation2]   ;;  %s17_s14 = int_to_ptr.hbm [resolvable:$true] %s16_s14 }
   0x3   :  { %s18_s16 = sshll.u32 %s186_s15, 4  ;;  %s26_s19 = sshll.u32 %s224_s1, 4  ;;  %s19_s16 = int_to_ptr.vmem [resolvable:$true] %s18_s16  ;;  %s27_s19 = int_to_ptr.hbm [resolvable:$true] %s26_s19 }
   0x4   :  { %21 = dma.hbm_to_vmem [thread:$0]  %s17_s14, 128, %s19_s16, [#allocation3]  }
   0x5   :  { %s187_s20 = smov [#allocation5]   ;;  %s188_s22 = smov 128  }
   0x6   :  { %s28_s21 = sshll.u32 %s187_s20, 4  ;;  %s189_s23 = smov 8   ;;  %s29_s21 = int_to_ptr.vmem [resolvable:$true] %s28_s21 }
   0x7   :  { %34 = dma.hbm_to_vmem [thread:$0]  %s27_s19, 1024, %s29_s21, [#allocation6], %s188_s22, %s188_s22, %s189_s23  }
   0x8   :  { %180 = dma.done.wait [#allocation3], 128  }
   0x9   :  { %181 = vsyncadd [#allocation3], 4294967168 }
   0xa   :  { %182 = dma.done.wait [#allocation6], 1024  }
   0xb   :  { %183 = vsyncadd [#allocation6], 4294966272  ;;  %v53_v0 = vld [vmem:[#allocation5 + $0x38] sm:$0xff]  ;;  %v52_v1 = vld [vmem:[#allocation5 + $0x30] sm:$0xff]  ;;  %vm58_vm0 = vcmask 523264   ;;  %s190_s24 = smov [#allocation7]  }
   0xc   :  { %70 = vmatpush.msra.mxu0 %v53_v0  ;;  %v51_v2 = vld [vmem:[#allocation5 + $0x28] sm:$0xff]  ;;  %v50_v3 = vld [vmem:[#allocation5 + $0x20] sm:$0xff]  ;;  %v49_v4 = vld [vmem:[#allocation5 + $0x18] sm:$0xff]  ;;  %s88_s25 = sshll.u32 %s190_s24, 4  ;;  %s90_s28 = sshll.u32 %s226_s3, 4  ;;  %s89_s25 = int_to_ptr.vmem [resolvable:$true] %s88_s25  ;;  %s91_s28 = int_to_ptr.hbm [resolvable:$true] %s90_s28 }
   0xd   :  { %v48_v5 = vld [vmem:[#allocation5 + $0x10] sm:$0xff]  ;;  %v47_v6 = vld [vmem:[#allocation5 + $0x8] sm:$0xff]  ;;  %v46_v7 = vld [vmem:[#allocation5] sm:$0xff] }
   0xe   :  { %71 = vmatpush.msra.mxu0 %v52_v1  ;;  %v45_v8 = vld [vmem:[#allocation2] sm:$0xff] }
   0xf   :  { %v107_v9 = vld [vmem:[%s225_s2] ss:$0 sm:$0xff] }
  0x10   :  { %72 = vmatpush.msra.mxu0 %v51_v2 }
  0x12   :  { %73 = vmatpush.msra.mxu0 %v50_v3 }
  0x14   :  { %74 = vmatpush.msra.mxu0 %v49_v4 }
  0x16   :  { %75 = vmatpush.msra.mxu0 %v48_v5 }
  0x18   :  { %76 = vmatpush.msra.mxu0 %v47_v6 }
  0x1a   :  { %77 = vmatpush.msra.mxu0 %v46_v7 }
  0x1b   :  { %101 = vmatmul.msk.f32.vlgmr.msra.gmra.mxu0 %vm58_vm0, %v45_v8 }
  0x98   :  { %v79_v10 = vpop.f32.mrf.mxu0 }
  0x99   :  { %v80_v11 = vadd.f32 %v107_v9, %v79_v10 }
  0x9b   :  { %82 = vst [vmem:[#allocation7] sm:$0xff] %v80_v11 }
  0x9c   :  { %93 = dma.vmem_to_hbm [thread:$0]  %s89_s25, 128, %s91_s28, [#allocation4]  }
  0x9d   :  { %184 = dma.done.wait [#allocation4], 128  }
  0x9e   :  { %185 = vsyncadd [#allocation4], 4294967168 }
  0x9f   :  { %98 = vsyncpa [#allocation3], 1 }
  0xa0   :  { %99 = vsyncpa [#allocation6], 1 }
  0xa1   :  { %100 = vsyncpa [#allocation4], 1 }

</bundles_post_ra>
